<compile_context>
chip_gen: v6e
topology: v6e:2x2x1
jax: 0.10.0
libtpu: 0.0.40
codegen_flags: <defaults>
</compile_context>

<pallas_src>
import functools

import jax
import jax.numpy as jnp
from jax.experimental import pallas as pl
from jax.experimental.pallas import tpu as pltpu


def _graph_conv_kernel(*refs, alpha, eps, add_residual, affine, mxu_dtype):
    if affine:
        x_ref, h0_ref, w_ref, gb_ref, o_ref = refs
    else:
        x_ref, h0_ref, w_ref, o_ref = refs

    x = x_ref[...]                                      # (N, Fin), input dtype
    support = (1.0 - alpha) * x + alpha * h0_ref[...]   # VPU

    # MXU matmul with f32 accumulation. Optionally cast operands to bf16
    # (full-rate MXU on v6e/v7x); BatchNorm statistics below stay in f32.
    lhs = support if mxu_dtype is None else support.astype(mxu_dtype)
    rhs = w_ref[...] if mxu_dtype is None else w_ref[...].astype(mxu_dtype)
    out = jnp.dot(lhs, rhs, preferred_element_type=jnp.float32)  # (N, Fout) f32

    # BatchNorm1d (training mode): per-feature mean / biased variance over N.
    # Moments are computed straight from `out` (E[x^2] - E[x]^2), then the
    # normalize + affine collapses to a single per-row FMA: out * scale + shift.
    inv_n = 1.0 / out.shape[0]
    mean = jnp.sum(out, axis=0, keepdims=True) * inv_n            # (1, Fout)
    sq_mean = jnp.sum(out * out, axis=0, keepdims=True) * inv_n   # (1, Fout)
    var = sq_mean - mean * mean
    inv_std = jax.lax.rsqrt(var + eps)                            # EUP slot

    if affine:  # static: non-default gamma/beta, shipped as one (2, Fout) tile
        gb = gb_ref[...].astype(jnp.float32)           # row 0: gamma, row 1: beta
        scale = inv_std * gb[0:1, :]
        shift = gb[1:2, :] - mean * scale
    else:
        scale = inv_std
        shift = -mean * inv_std

    result = out * scale + shift
    if add_residual:  # static: Fin == Fout
        result = result + x.astype(jnp.float32)

    o_ref[...] = result.astype(o_ref.dtype)


def graph_convolution_batched(x, h0, weight, gamma=None, beta=None, *,
                              alpha=0.5, eps=1e-5, mxu_dtype=None,
                              out_dtype=None):
    """B independent GraphConvolution forwards fused into one pallas_call.

    x, h0  : (B, N, Fin)
    weight : (Fin, Fout) shared across problems, or (B, Fin, Fout) per-problem
    gamma/beta : None (PyTorch defaults -> identity affine) or (Fout,)/(B, Fout)
    """
    b, n, fin = x.shape
    assert h0.shape == (b, n, fin)
    fout = weight.shape[-1]
    add_residual = (fin == fout)
    affine = (gamma is not None) or (beta is not None)
    out_dtype = x.dtype if out_dtype is None else out_dtype

    args = [x, h0, weight]
    in_specs = [
        pl.BlockSpec((None, n, fin), lambda i: (i, 0, 0)),
        pl.BlockSpec((None, n, fin), lambda i: (i, 0, 0)),
    ]
    if weight.ndim == 2:
        # Shared weight: constant index_map -> stays resident in VMEM.
        in_specs.append(pl.BlockSpec((fin, fout), lambda i: (0, 0)))
    else:
        assert weight.shape == (b, fin, fout)
        in_specs.append(pl.BlockSpec((None, fin, fout), lambda i: (i, 0, 0)))

    if affine:
        g = (jnp.ones((b, fout), jnp.float32) if gamma is None
             else jnp.broadcast_to(jnp.asarray(gamma, jnp.float32), (b, fout)))
        bt = (jnp.zeros((b, fout), jnp.float32) if beta is None
              else jnp.broadcast_to(jnp.asarray(beta, jnp.float32), (b, fout)))
        gb = jnp.stack([g, bt], axis=1)                    # (B, 2, Fout)
        args.append(gb)
        in_specs.append(pl.BlockSpec((None, 2, fout), lambda i: (i, 0, 0)))

    # Rough fused-block VMEM footprint (f32, double-buffered over the B axis).
    block_bytes = 4 * (2 * n * fin + n * fout + (2 * fout if affine else 0))
    if weight.ndim == 3:
        block_bytes += 4 * fin * fout
    vmem_est = 2 * block_bytes + (4 * fin * fout if weight.ndim == 2 else 0)
    assert vmem_est < (12 << 20), (
        "per-problem block too large for the fused single-pass kernel; "
        "use an N-tiled two-pass BatchNorm variant instead")

    kernel = functools.partial(
        _graph_conv_kernel, alpha=float(alpha), eps=float(eps),
        add_residual=add_residual, affine=affine, mxu_dtype=mxu_dtype)

    return pl.pallas_call(
        kernel,
        out_shape=jax.ShapeDtypeStruct((b, n, fout), out_dtype),
        grid=(b,),
        in_specs=in_specs,
        out_specs=pl.BlockSpec((None, n, fout), lambda i: (i, 0, 0)),
        compiler_params=pltpu.CompilerParams(
            dimension_semantics=("parallel",)),   # shards over v7x's 2 TCs
    )(*args)


def graph_convolution(x, h0, weight, gamma=None, beta=None, **kwargs):
    """Single-problem API matching the PyTorch module: x, h0 are (N, Fin)."""
    g = None if gamma is None else jnp.asarray(gamma).reshape(1, -1)
    b = None if beta is None else jnp.asarray(beta).reshape(1, -1)
    out = graph_convolution_batched(x[None], h0[None], weight, g, b, **kwargs)
    return out[0]


if __name__ == "__main__":
    # B independent problems, lane-dense hidden size (multiple of 128).
    B, N, F = 4, 256, 128
    ALPHA = 0.5

    key = jax.random.PRNGKey(0)
    kx, kh, kw = jax.random.split(key, 3)
    x = jax.random.normal(kx, (B, N, F), dtype=jnp.float32)
    h0 = jax.random.normal(kh, (B, N, F), dtype=jnp.float32)

    # reset_parameters: weight ~ U(-stdv, stdv), stdv = 1/sqrt(out_features)
    stdv = 1.0 / (F ** 0.5)
    weight = jax.random.uniform(kw, (F, F), dtype=jnp.float32,
                                minval=-stdv, maxval=stdv)

    def ref_forward(xb, hb, w, gamma=None, beta=None):
        support = (1.0 - ALPHA) * xb + ALPHA * hb
        out = support @ w
        mean = out.mean(axis=0, keepdims=True)
        var = ((out - mean) ** 2).mean(axis=0, keepdims=True)  # biased (train)
        out = (out - mean) / jnp.sqrt(var + 1e-5)
        if gamma is not None:
            out = out * gamma + beta
        return out + xb                                          # Fin == Fout

    # 1) Default module (gamma=1, beta=0 -> identity affine), f32 MXU path.
    out = graph_convolution_batched(x, h0, weight, alpha=ALPHA)
    out = jax.block_until_ready(out)
    ref = jax.vmap(lambda a, b: ref_forward(a, b, weight))(x, h0)
    assert out.shape == (B, N, F)
    assert jnp.max(jnp.abs(out - ref)) < 1e-3

    # 2) Non-default affine params + bf16-at-the-MXU fast path (f32 BN stats).
    kg, kb = jax.random.split(jax.random.PRNGKey(1))
    gamma = jax.random.uniform(kg, (F,), jnp.float32, minval=0.5, maxval=1.5)
    beta = 0.1 * jax.random.normal(kb, (F,), jnp.float32)
    out_bf = graph_convolution_batched(x, h0, weight, gamma, beta,
                                       alpha=ALPHA, mxu_dtype=jnp.bfloat16)
    out_bf = jax.block_until_ready(out_bf)
    ref_aff = jax.vmap(lambda a, b: ref_forward(a, b, weight, gamma, beta))(x, h0)
    assert jnp.max(jnp.abs(out_bf - ref_aff)) < 5e-2

    # 3) Single-problem wrapper (module-shaped 2-D API).
    out_single = graph_convolution(x[0], h0[0], weight, alpha=ALPHA)
    out_single = jax.block_until_ready(out_single)
    assert jnp.max(jnp.abs(out_single - ref[0])) < 1e-3

    print("KERNEL_OK")
</pallas_src>

<mosaic_0001>
module attributes {stable_mosaic.version = 11 : i64} {
  func.func @_graph_conv_kernel(%arg0: i32, %arg1: memref<1x256x128xf32, #tpu.memory_space<vmem>>, %arg2: memref<1x256x128xf32, #tpu.memory_space<vmem>>, %arg3: memref<128x128xf32, #tpu.memory_space<vmem>>, %arg4: memref<1x256x128xf32, #tpu.memory_space<vmem>>) attributes {dimension_semantics = [#tpu.dimension_semantics<parallel>], iteration_bounds = array<i64: 4>, scalar_prefetch = 0 : i64, scratch_operands = 0 : i64, tpu.core_type = #tpu.core_type<tc>, window_params = [{transform_indices = @transform_0, window_bounds = array<i64: 1, 256, 128>}, {transform_indices = @transform_1, window_bounds = array<i64: 1, 256, 128>}, {pipeline_mode = #tpu.pipeline_mode<synchronous>, transform_indices = @transform_2, window_bounds = array<i64: 128, 128>}, {transform_indices = @transform_3, window_bounds = array<i64: 1, 256, 128>}]} {
    %c0 = arith.constant 0 : index
    %c0_0 = arith.constant 0 : index
    %c0_1 = arith.constant 0 : index
    %0 = vector.load %arg1[%c0, %c0_0, %c0_1] : memref<1x256x128xf32, #tpu.memory_space<vmem>>, vector<1x256x128xf32>
    %1 = vector.shape_cast %0 : vector<1x256x128xf32> to vector<256x128xf32>
    %cst = arith.constant 5.000000e-01 : f32
    %2 = vector.broadcast %cst : f32 to vector<256x128xf32>
    %3 = arith.mulf %2, %1 : vector<256x128xf32>
    %c0_2 = arith.constant 0 : index
    %c0_3 = arith.constant 0 : index
    %c0_4 = arith.constant 0 : index
    %4 = vector.load %arg2[%c0_2, %c0_3, %c0_4] : memref<1x256x128xf32, #tpu.memory_space<vmem>>, vector<1x256x128xf32>
    %5 = vector.shape_cast %4 : vector<1x256x128xf32> to vector<256x128xf32>
    %cst_5 = arith.constant 5.000000e-01 : f32
    %6 = vector.broadcast %cst_5 : f32 to vector<256x128xf32>
    %7 = arith.mulf %6, %5 : vector<256x128xf32>
    %8 = arith.addf %3, %7 : vector<256x128xf32>
    %c0_6 = arith.constant 0 : index
    %c0_7 = arith.constant 0 : index
    %9 = vector.load %arg3[%c0_6, %c0_7] : memref<128x128xf32, #tpu.memory_space<vmem>>, vector<128x128xf32>
    %cst_8 = arith.constant dense<0.000000e+00> : vector<256x128xf32>
    %10 = tpu.matmul %8, %9, %cst_8 {dimension_numbers = #tpu.dot_dimension_numbers<[1], [0], [0], [1], [0, 0, 1, 1], [], []>} : vector<256x128xf32>, vector<128x128xf32>, vector<256x128xf32> -> vector<256x128xf32>
    %cst_9 = arith.constant dense<0.000000e+00> : vector<128xf32>
    %11 = vector.multi_reduction <add>, %10, %cst_9 [0] : vector<256x128xf32> to vector<128xf32>
    %12 = vector.shape_cast %11 : vector<128xf32> to vector<1x128xf32>
    %cst_10 = arith.constant 3.906250e-03 : f32
    %13 = vector.broadcast %cst_10 : f32 to vector<1x128xf32>
    %14 = arith.mulf %12, %13 : vector<1x128xf32>
    %15 = arith.mulf %10, %10 : vector<256x128xf32>
    %cst_11 = arith.constant dense<0.000000e+00> : vector<128xf32>
    %16 = vector.multi_reduction <add>, %15, %cst_11 [0] : vector<256x128xf32> to vector<128xf32>
    %17 = vector.shape_cast %16 : vector<128xf32> to vector<1x128xf32>
    %cst_12 = arith.constant 3.906250e-03 : f32
    %18 = vector.broadcast %cst_12 : f32 to vector<1x128xf32>
    %19 = arith.mulf %17, %18 : vector<1x128xf32>
    %20 = arith.mulf %14, %14 : vector<1x128xf32>
    %21 = arith.subf %19, %20 : vector<1x128xf32>
    %cst_13 = arith.constant 9.99999974E-6 : f32
    %22 = vector.broadcast %cst_13 : f32 to vector<1x128xf32>
    %23 = arith.addf %21, %22 : vector<1x128xf32>
    %24 = math.rsqrt %23 : vector<1x128xf32>
    %cst_14 = arith.constant 0.000000e+00 : f32
    %25 = vector.broadcast %cst_14 : f32 to vector<1x128xf32>
    %26 = arith.subf %25, %14 : vector<1x128xf32>
    %27 = arith.mulf %26, %24 : vector<1x128xf32>
    %28 = vector.broadcast %24 : vector<1x128xf32> to vector<256x128xf32>
    %29 = arith.mulf %10, %28 : vector<256x128xf32>
    %30 = vector.broadcast %27 : vector<1x128xf32> to vector<256x128xf32>
    %31 = arith.addf %29, %30 : vector<256x128xf32>
    %32 = arith.addf %31, %1 : vector<256x128xf32>
    %c0_15 = arith.constant 0 : index
    %c0_16 = arith.constant 0 : index
    %c0_17 = arith.constant 0 : index
    %33 = vector.load %arg4[%c0_15, %c0_16, %c0_17] : memref<1x256x128xf32, #tpu.memory_space<vmem>>, vector<1x256x128xf32>
    %34 = vector.shape_cast %33 : vector<1x256x128xf32> to vector<256x128xf32>
    %35 = vector.shape_cast %32 : vector<256x128xf32> to vector<1x256x128xf32>
    tpu.vector_store %arg4[%c0_15, %c0_16, %c0_17], %35 {strides = array<i32>} : memref<1x256x128xf32, #tpu.memory_space<vmem>>, vector<1x256x128xf32>,
    return
  }
  func.func @transform_0(%arg0: i32) -> (i32, i32, i32) {
    %c0_i32 = arith.constant 0 : i32
    %c0_i32_0 = arith.constant 0 : i32
    %c0_i32_1 = arith.constant 0 : i32
    return %arg0, %c0_i32, %c0_i32_0 : i32, i32, i32
  }
  func.func @transform_1(%arg0: i32) -> (i32, i32, i32) {
    %c0_i32 = arith.constant 0 : i32
    %c0_i32_0 = arith.constant 0 : i32
    %c0_i32_1 = arith.constant 0 : i32
    return %arg0, %c0_i32, %c0_i32_0 : i32, i32, i32
  }
  func.func @transform_2(%arg0: i32) -> (i32, i32) {
    %c0_i32 = arith.constant 0 : i32
    %c0_i32_0 = arith.constant 0 : i32
    %c0_i32_1 = arith.constant 0 : i32
    return %c0_i32, %c0_i32_0 : i32, i32
  }
  func.func @transform_3(%arg0: i32) -> (i32, i32, i32) {
    %c0_i32 = arith.constant 0 : i32
    %c0_i32_0 = arith.constant 0 : i32
    %c0_i32_1 = arith.constant 0 : i32
    return %arg0, %c0_i32, %c0_i32_0 : i32, i32, i32
  }
}

</mosaic_0001>

<bundles_post_ra>
// kernel: tpu_custom_call.1
= control target key start
LH: loop header
LB: loop body
LE: loop exit
PB: predicated region body
PF: predicated region fallthrough
CT: control target
= control target key end

     0   :  { %s2125_s0 = inlined_call_operand.hbm [shape: f32[4,256,128], index: 0, kind: input, shape index: {}]   ;;  %s2126_s1 = inlined_call_operand.hbm [shape: f32[4,256,128], index: 1, kind: input, shape index: {}]   ;;  %s2127_s2 = inlined_call_operand.hbm [shape: f32[128,128], index: 2, kind: input, shape index: {}]   ;;  %s2128_s3 = inlined_call_operand.hbm [shape: f32[4,256,128], index: 3, kind: output, shape index: {}]  }
   0x1   :  { %2160 = sst [smem:[#allocation37_spill]] %s2125_s0 }
   0x2   :  { %2161 = sst [smem:[#allocation38_spill]] %s2127_s2 }
   0x3   :  { %8 = vsyncpa [#allocation3], 0 }
   0x4   :  { %10 = vsyncpa [#allocation3 + $0x1], 0 }
   0x5   :  { %11 = vsyncpa [#allocation6], 0 }
   0x6   :  { %13 = vsyncpa [#allocation6 + $0x1], 0 }
   0x7   :  { %14 = vsyncpa [#allocation4], 0 }
   0x8   :  { %16 = vsyncpa [#allocation4 + $0x1], 0  ;;  %s1440_s12 = smov 0   ;;  %s1442_s13 = smov 0  }
   0x9   :  { %s1444_s14 = smov 0   ;;  %s1446_s15 = smov 0  }
   0xa LB: > { %s1461_s16 = sadd.s32 4294967295, %s1410_s15   ;;  %s1005_s17 = sadd.s32 4294967294, %s1410_s15   ;;  %s1410_s15 = sphi %s1446_s15, %s2229_s15   ;;  %s1406_s14 = sphi %s1444_s14, %s2228_s14   ;;  %s1402_s13 = sphi %s1442_s13, %s2227_s13   ;;  %s1398_s12 = sphi %s1440_s12, %s2226_s12  }
   0xb   : > { %p42_p0 = scmp.ne.s32.totalorder %s1402_s13, %s1398_s12  ;;  %p2133_p1 = scmp.eq.s32.totalorder %s1461_s16, 0 }
   0xc   : > { %p119_p3 = scmp.eq.s32.totalorder %s1005_s17, 3  ;;  %p1006_p5 = scmp.ge.s32.totalorder %s1410_s15, 1 }
   0xd   : > { %p1470_p4 = por %p2133_p1, %p42_p0  ;;  %p126_p7 = scmp.lt.s32.totalorder %s1410_s15, 5 }
   0xe   : > { %p1475_p6 = por %p119_p3, %p42_p0  ;;  %s1412_s21 = smov [#allocation7]  }
   0xf   : > { %s2162_s18 = scalar_select %p1470_p4, 1, 0 }
  0x10   : > { %s2163_s19 = scalar_select %p1475_p6, 1, 0 }
  0x11   : > { %p1480_p8 = pnand %p1006_p5, %p126_p7  ;;  %s138_s22 = sshll.u32 %s1412_s21, 4  ;;  %s139_s22 = int_to_ptr.vmem [resolvable:$true] %s138_s22 }
  0x12   : > { %s1493_s24 = sadd.s32 1, %s1410_s15   ;;  %s29_s25 = sadd.s32 1, %s1406_s14 }
  0x13   : > { %p1198_p9 = pneg %p1480_p8  ;;  %s26_s26 = ssub.s32 %s1410_s15, %s1493_s24 }
  0x14   : > { %s1267_s27 = scalar_lea.vmem %s139_s22, 2048  ;;  %p1275_p3 = scmp.lt.s32.totalorder %s139_s22, %s139_s22 }
  0x15   : > { %p1488_p10 = pnand %p1198_p9, %p2133_p1  ;;  %p1268_p12 = scmp.ne.s32.totalorder %s139_s22, %s1267_s27 }
  0x16   : > { %p1276_p5 = scmp.lt.s32.totalorder %s1267_s27, %s1267_s27 }
  0x17   : > { %p1258_p11 = pneg %p1488_p10 }
  0x18   : > { %p1277_p7 = por %p1276_p5, %p1275_p3 }
  0x19   : > { %p1270_p13 = pnand %p1268_p12, %p1258_p11 }
  0x1b   : > { %p1271_p0 = pneg %p1270_p13 }
  0x1d   : > { %p1278_p2 = pnand %p1277_p7, %p1271_p0 }
  0x1f   : > { %1281 = shalt.err (!%p1278_p2)
}
  0x20   : > { %s2129_s28 = smov 128   ;;  %s2131_s29 = smov 8  }
  0x21   : > { %s2166_s2 = sld [smem:[#allocation38_spill]]  ;;  %p27_p2 = scmp.eq.s32.totalorder %s26_s26, 0 }
  0x22   : > { %p36_p9 = scmp.ne.s32.totalorder %s1406_s14, %s1402_s13  ;;  %p37_p11 = scmp.eq.s32.totalorder %s1410_s15, 0 }
  0x23   : > { %p1214_p12 = scmp.lt.s32.totalorder %s1410_s15, 4  ;;  %p2167_p0 = scmp.eq.s32.totalorder %s1461_s16, 3 }
  0x24   : > { %s1513_s5 = scalar_select %p27_p2, %s1406_s14, %s29_s25  }
  0x25   : > { %p38_p13 = por %p37_p11, %p36_p9  ;;  %p1517_p3 = por %p2167_p0, %p36_p9 }
  0x26   : > { %s152_s7 = sand.u32 1, %s1406_s14   ;;  %s1025_s8 = sshll.u32 %s1410_s15, 12 }
  0x27   : > { %1201 = dma.hbm_to_vmem [thread:$0]  (!%p1488_p10), %s2166_s2, 2048, %s139_s22, [#allocation6], %s2129_s28, %s2129_s28, %s2131_s29  }
  0x28   : > { %s2168_s6 = scalar_select %p1517_p3, 1, 0 }
  0x29   : > { %s1523_s9 = sshll.u32 %s152_s7, 8  ;;  %s2169_s0 = sld [smem:[#allocation37_spill]] }
  0x2a   : > { %s156_s21 = scalar_lea.vmem [#allocation2], %s1523_s9  ;;  %p1531_p10 = pnand %p1214_p12, %p38_p13 }
  0x2b   : > { %s163_s22 = sshll.u32 %s156_s21, 4  ;;  %s1540_s27 = scalar_lea.hbm %s2126_s1, %s1025_s8  ;;  %s1535_s22 = int_to_ptr.vmem [resolvable:$true] %s163_s22 }
  0x2c   : > { %s1542_s30 = scalar_lea.sflag [#allocation3], %s152_s7  ;;  %p1284_p7 = pneg %p1531_p10 }
  0x2f   : > { %s1528_s17 = scalar_lea.hbm %s2169_s0, %s1025_s8  ;;  %s1287_s21 = scalar_lea.hbm %s2169_s0, 16384 }
  0x30   : > { %s1282_s4 = scalar_lea.hbm %s1528_s17, 4096  ;;  %p1288_p11 = scmp.lt.s32.totalorder %s1528_s17, %s2169_s0 }
  0x31   : > { %p1283_p5 = scmp.ne.s32.totalorder %s1528_s17, %s1282_s4  ;;  %p1289_p12 = scmp.lt.s32.totalorder %s1287_s21, %s1282_s4 }
  0x33   : > { %p1285_p2 = pnand %p1284_p7, %p1283_p5  ;;  %p1290_p13 = por %p1289_p12, %p1288_p11 }
  0x35   : > { %p1286_p9 = pneg %p1285_p2 }
  0x37   : > { %p1291_p0 = pnand %p1290_p13, %p1286_p9 }
  0x39   : > { %1294 = shalt.err (!%p1291_p0)
}
  0x3a   : > { %s1295_s7 = scalar_lea.vmem %s1535_s22, 4096  ;;  %s1415_s8 = smov [#allocation2]  }
  0x3b   : > { %p1296_p1 = scmp.ne.s32.totalorder %s1535_s22, %s1295_s7  ;;  %s1300_s25 = sshll.u32 %s1415_s8, 4  ;;  %s1301_s25 = int_to_ptr.vmem [resolvable:$false] %s1300_s25 }
  0x3c   : > { %s1302_s26 = scalar_lea.vmem %s1301_s25, 8192  ;;  %p1303_p6 = scmp.lt.s32.totalorder %s1535_s22, %s1301_s25 }
  0x3d   : > { %p1298_p5 = pnand %p1296_p1, %p1284_p7  ;;  %p1304_p3 = scmp.lt.s32.totalorder %s1302_s26, %s1295_s7 }
  0x3f   : > { %p1299_p2 = pneg %p1298_p5  ;;  %p1305_p4 = por %p1304_p3, %p1303_p6 }
  0x41   : > { %p1306_p11 = pnand %p1305_p4, %p1299_p2 }
  0x43   : > { %1309 = shalt.err (!%p1306_p11)
}
  0x44   : > { %s2171_s28 = smov 8   ;;  %s2172_s29 = smov 128  }
  0x45   : > { %1205 = dma.hbm_to_vmem [thread:$0]  (!%p1531_p10), %s1528_s17, 4096, %s1535_s22, %s1542_s30, %s2172_s29, %s2172_s29, %s2171_s28  }
  0x46   : > { %s177_s4 = scalar_lea.vmem [#allocation5], %s1523_s9  ;;  %s173_s11 = sand.u32 1, %s1410_s15  }
  0x47   : > { %s184_s10 = sshll.u32 %s177_s4, 4  ;;  %s174_s21 = scalar_lea.sflag [#allocation6], %s173_s11  ;;  %s1574_s10 = int_to_ptr.vmem [resolvable:$true] %s184_s10 }
  0x48   : > { %s1310_s7 = scalar_lea.hbm %s1540_s27, 4096  ;;  %s1315_s26 = scalar_lea.hbm %s2126_s1, 16384 }
  0x49   : > { %p1311_p1 = scmp.ne.s32.totalorder %s1540_s27, %s1310_s7  ;;  %p1316_p3 = scmp.lt.s32.totalorder %s1540_s27, %s2126_s1 }
  0x4a   : > { %p1317_p9 = scmp.lt.s32.totalorder %s1315_s26, %s1310_s7 }
  0x4b   : > { %p1313_p4 = pnand %p1311_p1, %p1284_p7 }
  0x4c   : > { %p1318_p12 = por %p1317_p9, %p1316_p3 }
  0x4d   : > { %p1314_p6 = pneg %p1313_p4 }
  0x4f   : > { %p1319_p13 = pnand %p1318_p12, %p1314_p6 }
  0x51   : > { %1322 = shalt.err (!%p1319_p13)
}
  0x52   : > { %s1323_s9 = scalar_lea.vmem %s1574_s10, 4096  ;;  %s1416_s17 = smov [#allocation5]  }
  0x53   : > { %p1324_p0 = scmp.ne.s32.totalorder %s1574_s10, %s1323_s9  ;;  %s1328_s22 = sshll.u32 %s1416_s17, 4  ;;  %s1329_s22 = int_to_ptr.vmem [resolvable:$false] %s1328_s22 }
  0x54   : > { %s1330_s30 = scalar_lea.vmem %s1329_s22, 8192  ;;  %p1331_p11 = scmp.lt.s32.totalorder %s1574_s10, %s1329_s22 }
  0x55   : > { %p1326_p5 = pnand %p1324_p0, %p1284_p7  ;;  %p1332_p1 = scmp.lt.s32.totalorder %s1330_s30, %s1323_s9 }
  0x57   : > { %p1327_p2 = pneg %p1326_p5  ;;  %p1333_p4 = por %p1332_p1, %p1331_p11 }
  0x59   : > { %p1334_p3 = pnand %p1333_p4, %p1327_p2 }
  0x5b   : > { %1337 = shalt.err (!%p1334_p3)
}
  0x5c   : > { %1208 = dma.hbm_to_vmem [thread:$0]  (!%p1531_p10), %s1540_s27, 4096, %s1574_s10, %s174_s21, %s2172_s29, %s2172_s29, %s2171_s28  }
  0x5d   : > { %196 = sbr.rel (%p1480_p8) target bundleno = 482 (0x1e2), region = 32 }
  0x62   : > { %s1604_s0 = sand.u32 1, %s1402_s13   ;;  %p2173_p7 = scmp.ne.s32.totalorder %s2162_s18, 0 }
  0x63   : > { %s1607_s2 = sshll.u32 %s1604_s0, 8  ;;  %s199_s4 = scalar_lea.sflag [#allocation3], %s1604_s0 }
  0x64   : > { %s1611_s23 = scalar_lea.vmem [#allocation2], %s1607_s2 }
  0x65   : > { %1381 = dma.done.wait (%p2173_p7), %s199_s4, 4096  }
  0x66   : > { %1383 = vsyncadd (%p2173_p7), %s199_s4, 4294963200  ;;  %s207_s20 = sand.u32 1, %s1461_s16   ;;  %s1619_s28 = scalar_lea.vmem [#allocation5], %s1607_s2 }
  0x67   : > { %s208_s27 = scalar_lea.sflag [#allocation6], %s207_s20 }
  0x68   : > { %1385 = dma.done.wait (%p2173_p7), %s208_s27, 4096  }
  0x69   : > { %1387 = vsyncadd (%p2173_p7), %s208_s27, 4294963200  ;;  %p2174_p8 = scmp.eq.s32.totalorder %s1461_s16, 0 }
  0x6b   : > { %1389 = dma.done.wait (%p2174_p8), [#allocation6], 2048   ;;  %p2175_p10 = pmov %p2174_p8 }
  0x6c   : > { %v418_v0 = vld [vmem:[#allocation7 + $0x78] sm:$0xff]  ;;  %v417_v1 = vld [vmem:[#allocation7 + $0x70] sm:$0xff]  ;;  %v416_v2 = vld [vmem:[#allocation7 + $0x68] sm:$0xff]  ;;  %s1969_s18 = scalar_lea.vmem [#allocation8], %s1607_s2  ;;  %s1027_s29 = sshll.u32 %s1461_s16, 12 }
  0x6d   : > { %1391 = vsyncadd (%p2175_p10), [#allocation6], 4294965248  ;;  %1076 = vmatprep.subr.mxu0 %v418_v0  ;;  %1156 = vmatprep.subr.mxu1 %v418_v0  ;;  %v415_v3 = vld [vmem:[#allocation7 + $0x60] sm:$0xff]  ;;  %v414_v6 = vld [vmem:[#allocation7 + $0x58] sm:$0xff]  ;;  %s900_s10 = sshll.u32 %s1969_s18, 4  ;;  %s2071_s21 = scalar_lea.hbm %s2128_s3, %s1027_s29  ;;  %s2073_s10 = int_to_ptr.vmem [resolvable:$true] %s900_s10 }
  0x6e   : > { %1077 = vmatpush3.msra.mxu0 %v418_v0  ;;  %1172 = vmatpush3.msra.mxu1 %v418_v0  ;;  %v1630_v4 = vld [vmem:[%s1611_s23] sm:$0xff]  ;;  %v413_v9 = vld [vmem:[#allocation7 + $0x50] sm:$0xff]  ;;  %v412_v11 = vld [vmem:[#allocation7 + $0x48] sm:$0xff]  ;;  %s887_s7 = scalar_lea.sflag [#allocation4], %s1604_s0  ;;  %s1338_s8 = scalar_lea.vmem %s2073_s10, 4096 }
  0x6f   : > { %1078 = vmatprep.subr.mxu0 %v417_v1  ;;  %1157 = vmatprep.subr.mxu1 %v417_v1  ;;  %v307_v5 = vld [vmem:[%s1619_s28] sm:$0xff]  ;;  %v275_v7 = vmul.f32 0.5, %v1630_v4  ;;  %v410_v13 = vld [vmem:[#allocation7 + $0x38] sm:$0xff]  ;;  %v409_v14 = vld [vmem:[#allocation7 + $0x30] sm:$0xff]  ;;  %p1339_p6 = scmp.ne.s32.totalorder %s2073_s10, %s1338_s8  ;;  %p2224_p9 = scmp.ne.s32.totalorder %s2168_s6, 0 }
  0x70   : > { %1079 = vmatpush3.msra.mxu0 %v417_v1  ;;  %1173 = vmatpush3.msra.mxu1 %v417_v1  ;;  %v339_v8 = vmul.f32 0.5, %v307_v5  ;;  %v411_v12 = vld [vmem:[#allocation7 + $0x40] sm:$0xff]  ;;  %v408_v15 = vld [vmem:[#allocation7 + $0x28] sm:$0xff]  ;;  %v406_v17 = vld [vmem:[#allocation7 + $0x18] sm:$0xff]  ;;  %s1417_s25 = smov [#allocation8]  }
  0x71   : > { %1080 = vmatprep.subr.mxu0 %v416_v2  ;;  %1158 = vmatprep.subr.mxu1 %v416_v2  ;;  %v407_v16 = vld [vmem:[#allocation7 + $0x20] sm:$0xff]  ;;  %v1635_v18 = vld [vmem:[%s1611_s23 + $0x8] sm:$0xff]  ;;  %v1639_v20 = vld [vmem:[%s1611_s23 + $0x10] sm:$0xff]  ;;  %p1340_p12 = pnand %p1339_p6, %p2224_p9  ;;  %s1342_s26 = sshll.u32 %s1417_s25, 4  ;;  %s1343_s26 = int_to_ptr.vmem [resolvable:$false] %s1342_s26 }
  0x72   : > { %1081 = vmatpush3.msra.mxu0 %v416_v2  ;;  %1174 = vmatpush3.msra.mxu1 %v416_v2  ;;  %v371_v10 = vadd.f32 %v339_v8, %v275_v7  ;;  %v308_v19 = vld [vmem:[%s1619_s28 + $0x8] sm:$0xff]  ;;  %v309_v21 = vld [vmem:[%s1619_s28 + $0x10] sm:$0xff]  ;;  %v1643_v22 = vld [vmem:[%s1611_s23 + $0x80] sm:$0xff]  ;;  %v276_v28 = vmul.f32 0.5, %v1635_v18  ;;  %v277_v32 = vmul.f32 0.5, %v1639_v20  ;;  %s1344_s9 = scalar_lea.vmem %s1343_s26, 8192  ;;  %p1345_p0 = scmp.lt.s32.totalorder %s2073_s10, %s1343_s26 }
  0x73   : > { %1082 = vmatprep.subr.mxu0 %v415_v3  ;;  %1159 = vmatprep.subr.mxu1 %v415_v3  ;;  %2176 = vst [vmem:[#allocation13_spill] sm:$0xff] %v1643_v22  ;;  %v323_v23 = vld [vmem:[%s1619_s28 + $0x80] sm:$0xff]  ;;  %v405_v24 = vld [vmem:[#allocation7 + $0x10] sm:$0xff]  ;;  %v1647_v25 = vld [vmem:[%s1611_s23 + $0x88] sm:$0xff]  ;;  %v340_v29 = vmul.f32 0.5, %v308_v19  ;;  %v341_v33 = vmul.f32 0.5, %v309_v21  ;;  %p1341_p13 = pneg %p1340_p12  ;;  %p1346_p5 = scmp.lt.s32.totalorder %s1344_s9, %s1338_s8 }
  0x74   : > { %1083 = vmatpush3.msra.mxu0 %v415_v3  ;;  %1175 = vmatpush3.msra.mxu1 %v415_v3  ;;  %2177 = vst [vmem:[#allocation14_spill] sm:$0xff] %v1647_v25  ;;  %v324_v26 = vld [vmem:[%s1619_s28 + $0x88] sm:$0xff]  ;;  %v1652_v30 = vld [vmem:[%s1611_s23 + $0x90] sm:$0xff]  ;;  %v1657_v34 = vld [vmem:[%s1611_s23 + $0x18] sm:$0xff]  ;;  %v291_v36 = vmul.f32 0.5, %v1643_v22  ;;  %v355_v37 = vmul.f32 0.5, %v323_v23 }
  0x75   : > { %1084 = vmatprep.subr.mxu0 %v414_v6  ;;  %1160 = vmatprep.subr.mxu1 %v414_v6  ;;  %v404_v27 = vld [vmem:[#allocation7 + $0x8] sm:$0xff]  ;;  %2178 = vst [vmem:[#allocation15_spill] sm:$0xff] %v1652_v30  ;;  %v325_v31 = vld [vmem:[%s1619_s28 + $0x90] sm:$0xff]  ;;  %v310_v35 = vld [vmem:[%s1619_s28 + $0x18] sm:$0xff]  ;;  %v292_v40 = vmul.f32 0.5, %v1647_v25  ;;  %v356_v41 = vmul.f32 0.5, %v324_v26  ;;  %v372_v47 = vadd.f32 %v340_v29, %v276_v28  ;;  %v373_v52 = vadd.f32 %v341_v33, %v277_v32  ;;  %p1347_p2 = por %p1346_p5, %p1345_p0 }
  0x76   : > { %1085 = vmatpush3.msra.mxu0 %v414_v6  ;;  %1108 = vmatprep.mubr.f32.mxu0 %v371_v10  ;;  %v1662_v38 = vld [vmem:[%s1611_s23 + $0x20] sm:$0xff]  ;;  %v293_v43 = vmul.f32 0.5, %v1652_v30  ;;  %v357_v44 = vmul.f32 0.5, %v325_v31  ;;  %v1668_v45 = vld [vmem:[%s1611_s23 + $0x98] sm:$0xff]  ;;  %v278_v48 = vmul.f32 0.5, %v1657_v34  ;;  %v342_v49 = vmul.f32 0.5, %v310_v35 }
  0x77   : > { %1086 = vmatprep.subr.mxu0 %v413_v9  ;;  %1176 = vmatpush3.msra.mxu1 %v414_v6  ;;  %v311_v39 = vld [vmem:[%s1619_s28 + $0x20] sm:$0xff]  ;;  %2179 = vst [vmem:[#allocation16_spill] sm:$0xff] %v1668_v45  ;;  %v326_v46 = vld [vmem:[%s1619_s28 + $0x98] sm:$0xff]  ;;  %v279_v53 = vmul.f32 0.5, %v1662_v38  ;;  %v1678_v55 = vld [vmem:[%s1611_s23 + $0x28] sm:$0xff]  ;;  %v387_v57 = vadd.f32 %v355_v37, %v291_v36  ;;  %v388_v60 = vadd.f32 %v356_v41, %v292_v40  ;;  %v294_v61 = vmul.f32 0.5, %v1668_v45  ;;  %p1348_p11 = pnand %p1347_p2, %p1341_p13 }
  0x78   : > { %1087 = vmatpush3.msra.mxu0 %v413_v9  ;;  %1161 = vmatprep.subr.mxu1 %v413_v9  ;;  %v403_v42 = vld [vmem:[#allocation7] sm:$0xff]  ;;  %v343_v54 = vmul.f32 0.5, %v311_v39  ;;  %v312_v56 = vld [vmem:[%s1619_s28 + $0x28] sm:$0xff]  ;;  %v1682_v58 = vld [vmem:[%s1611_s23 + $0x30] sm:$0xff]  ;;  %v358_v62 = vmul.f32 0.5, %v326_v46  ;;  %v389_v63 = vadd.f32 %v357_v44, %v293_v43  ;;  %v374_v5 = vadd.f32 %v342_v49, %v278_v48 }
  0x79   : > { %1088 = vmatprep.subr.mxu0 %v412_v11  ;;  %1177 = vmatpush3.msra.mxu1 %v413_v9  ;;  %v1673_v50 = vld [vmem:[%s1611_s23 + $0xa0] sm:$0xff]  ;;  %v313_v59 = vld [vmem:[%s1619_s28 + $0x30] sm:$0xff]  ;;  %v1688_v2 = vld [vmem:[%s1611_s23 + $0xa8] sm:$0xff]  ;;  %v280_v6 = vmul.f32 0.5, %v1678_v55  ;;  %v344_v7 = vmul.f32 0.5, %v312_v56 }
  0x7a   : > { %1089 = vmatpush3.msra.mxu0 %v412_v11  ;;  %1162 = vmatprep.subr.mxu1 %v412_v11  ;;  %2180 = vst [vmem:[#allocation17_spill] sm:$0xff] %v1673_v50  ;;  %v327_v51 = vld [vmem:[%s1619_s28 + $0xa0] sm:$0xff]  ;;  %v295_v0 = vmul.f32 0.5, %v1673_v50  ;;  %2181 = vst [vmem:[#allocation18_spill] sm:$0xff] %v1688_v2  ;;  %v328_v3 = vld [vmem:[%s1619_s28 + $0xa8] sm:$0xff]  ;;  %v375_v10 = vadd.f32 %v343_v54, %v279_v53  ;;  %v296_v19 = vmul.f32 0.5, %v1688_v2 }
  0x7b   : > { %1090 = vmatprep.subr.mxu0 %v411_v12  ;;  %1178 = vmatpush3.msra.mxu1 %v412_v11  ;;  %v359_v1 = vmul.f32 0.5, %v327_v51  ;;  %v1693_v8 = vld [vmem:[%s1611_s23 + $0xb0] sm:$0xff]  ;;  %v281_v11 = vmul.f32 0.5, %v1682_v58  ;;  %v360_v21 = vmul.f32 0.5, %v328_v3  ;;  %v330_v28 = vld [vmem:[%s1619_s28 + $0xb8] sm:$0xff]  ;;  %v376_v29 = vadd.f32 %v344_v7, %v280_v6  ;;  %v1713_v33 = vld [vmem:[%s1611_s23 + $0xc0] sm:$0xff] }
  0x7c   : > { %1091 = vmatpush3.msra.mxu0 %v411_v12  ;;  %1163 = vmatprep.subr.mxu1 %v411_v12  ;;  %2182 = vst [vmem:[#allocation19_spill] sm:$0xff] %v1693_v8  ;;  %v329_v9 = vld [vmem:[%s1619_s28 + $0xb0] sm:$0xff]  ;;  %2186 = vst [vmem:[#allocation23_spill] sm:$0xff] %v1713_v33  ;;  %v331_v35 = vld [vmem:[%s1619_s28 + $0xc0] sm:$0xff]  ;;  %v299_v49 = vmul.f32 0.5, %v1713_v33 }
  0x7d   : > { %1092 = vmatprep.subr.mxu0 %v410_v13  ;;  %1179 = vmatpush3.msra.mxu1 %v411_v12  ;;  %v345_v12 = vmul.f32 0.5, %v313_v59  ;;  %v391_v23 = vadd.f32 %v359_v1, %v295_v0  ;;  %v361_v26 = vmul.f32 0.5, %v329_v9  ;;  %v1718_v40 = vld [vmem:[%s1611_s23 + $0x48] sm:$0xff]  ;;  %v317_v43 = vld [vmem:[%s1619_s28 + $0x50] sm:$0xff]  ;;  %v392_v44 = vadd.f32 %v360_v21, %v296_v19  ;;  %v1738_v0 = vld [vmem:[%s1611_s23 + $0x58] sm:$0xff] }
  0x7e   : > { %1093 = vmatpush3.msra.mxu0 %v410_v13  ;;  %1164 = vmatprep.subr.mxu1 %v410_v13  ;;  %2187 = vst [vmem:[#allocation24_spill] sm:$0xff] %v1718_v40  ;;  %v316_v41 = vld [vmem:[%s1619_s28 + $0x48] sm:$0xff]  ;;  %v363_v51 = vmul.f32 0.5, %v331_v35  ;;  %v284_v56 = vmul.f32 0.5, %v1718_v40  ;;  %v1733_v59 = vld [vmem:[%s1611_s23 + $0xd0] sm:$0xff]  ;;  %2191 = vst [vmem:[#allocation28_spill] sm:$0xff] %v1738_v0 }
  0x7f   : > { %1094 = vmatprep.subr.mxu0 %v409_v14  ;;  %1180 = vmatpush3.msra.mxu1 %v410_v13  ;;  %v1698_v13 = vld [vmem:[%s1611_s23 + $0x38] sm:$0xff]  ;;  %v377_v36 = vadd.f32 %v345_v12, %v281_v11  ;;  %v332_v53 = vld [vmem:[%s1619_s28 + $0xc8] sm:$0xff]  ;;  %2190 = vst [vmem:[#allocation27_spill] sm:$0xff] %v1733_v59  ;;  %v1742_v3 = vld [vmem:[%s1611_s23 + $0x60] sm:$0xff]  ;;  %v301_v11 = vmul.f32 0.5, %v1733_v59  ;;  %v286_v19 = vmul.f32 0.5, %v1738_v0 }
  0x80   : > { %1095 = vmatpush3.msra.mxu0 %v409_v14  ;;  %1165 = vmatprep.subr.mxu1 %v409_v14  ;;  %2183 = vst [vmem:[#allocation20_spill] sm:$0xff] %v1698_v13  ;;  %v282_v31 = vmul.f32 0.5, %v1698_v13  ;;  %v318_v1 = vld [vmem:[%s1619_s28 + $0x58] sm:$0xff]  ;;  %2192 = vst [vmem:[#allocation29_spill] sm:$0xff] %v1742_v3  ;;  %v364_v9 = vmul.f32 0.5, %v332_v53  ;;  %v1762_v35 = vld [vmem:[%s1611_s23 + $0x70] sm:$0xff] }
  0x81   : > { %1096 = vmatprep.subr.mxu0 %v408_v15  ;;  %1181 = vmatpush3.msra.mxu1 %v409_v14  ;;  %v314_v14 = vld [vmem:[%s1619_s28 + $0x38] sm:$0xff]  ;;  %v350_v21 = vmul.f32 0.5, %v318_v1  ;;  %2196 = vst [vmem:[#allocation33_spill] sm:$0xff] %v1762_v35 }
  0x82   : > { %1097 = vmatpush3.msra.mxu0 %v408_v15  ;;  %1166 = vmatprep.subr.mxu1 %v408_v15  ;;  %v346_v32 = vmul.f32 0.5, %v314_v14  ;;  %v1748_v14 = vld [vmem:[%s1611_s23 + $0xd8] sm:$0xff] }
  0x83   : > { %1098 = vmatprep.subr.mxu0 %v407_v16  ;;  %1182 = vmatpush3.msra.mxu1 %v408_v15  ;;  %v1702_v15 = vld [vmem:[%s1611_s23 + $0x40] sm:$0xff]  ;;  %2193 = vst [vmem:[#allocation30_spill] sm:$0xff] %v1748_v14 }
  0x84   : > { %1099 = vmatpush3.msra.mxu0 %v407_v16  ;;  %1167 = vmatprep.subr.mxu1 %v407_v16  ;;  %2184 = vst [vmem:[#allocation21_spill] sm:$0xff] %v1702_v15  ;;  %v283_v37 = vmul.f32 0.5, %v1702_v15  ;;  %v378_v54 = vadd.f32 %v346_v32, %v282_v31  ;;  %v1758_v31 = vld [vmem:[%s1611_s23 + $0x68] sm:$0xff] }
  0x85   : > { %1100 = vmatprep.subr.mxu0 %v406_v17  ;;  %1183 = vmatpush3.msra.mxu1 %v407_v16  ;;  %v315_v16 = vld [vmem:[%s1619_s28 + $0x40] sm:$0xff]  ;;  %2195 = vst [vmem:[#allocation32_spill] sm:$0xff] %v1758_v31  ;;  %v320_v32 = vld [vmem:[%s1619_s28 + $0x68] sm:$0xff] }
  0x86   : > { %1101 = vmatpush3.msra.mxu0 %v406_v17  ;;  %1168 = vmatprep.subr.mxu1 %v406_v17  ;;  %v347_v39 = vmul.f32 0.5, %v315_v16  ;;  %v334_v16 = vld [vmem:[%s1619_s28 + $0xd8] sm:$0xff]  ;;  %v352_v53 = vmul.f32 0.5, %v320_v32 }
  0x87   : > { %1102 = vmatprep.subr.mxu0 %v405_v24  ;;  %1184 = vmatpush3.msra.mxu1 %v406_v17  ;;  %v390_v17 = vadd.f32 %v358_v62, %v294_v61 }
  0x88   : > { %1103 = vmatpush3.msra.mxu0 %v405_v24  ;;  %1169 = vmatprep.subr.mxu1 %v405_v24  ;;  %v379_v61 = vadd.f32 %v347_v39, %v283_v37  ;;  %v302_v39 = vmul.f32 0.5, %v1748_v14 }
  0x89   : > { %1104 = vmatprep.subr.mxu0 %v404_v27  ;;  %1185 = vmatpush3.msra.mxu1 %v405_v24  ;;  %v297_v24 = vmul.f32 0.5, %v1693_v8 }
  0x8a   : > { %1105 = vmatpush3.msra.mxu0 %v404_v27  ;;  %1170 = vmatprep.subr.mxu1 %v404_v27 }
  0x8b   : > { %1106 = vmatprep.subr.mxu0 %v403_v42  ;;  %1186 = vmatpush3.msra.mxu1 %v404_v27  ;;  %v1708_v27 = vld [vmem:[%s1611_s23 + $0xb8] sm:$0xff]  ;;  %v393_v48 = vadd.f32 %v361_v26, %v297_v24  ;;  %v335_v24 = vld [vmem:[%s1619_s28 + $0xe0] sm:$0xff] }
  0x8c   : > { %1107 = vmatpush3.msra.mxu0 %v403_v42  ;;  %1171 = vmatprep.subr.mxu1 %v403_v42  ;;  %2185 = vst [vmem:[#allocation22_spill] sm:$0xff] %v1708_v27  ;;  %v298_v46 = vmul.f32 0.5, %v1708_v27 }
  0x8d   : > { %1109 = vmatmul.mubr.f32.vlgmr.msra.gmra.mxu0 %v372_v47  ;;  %1187 = vmatpush3.msra.mxu1 %v403_v42  ;;  %v1722_v42 = vld [vmem:[%s1611_s23 + $0x50] sm:$0xff]  ;;  %v362_v47 = vmul.f32 0.5, %v330_v28  ;;  %v287_v28 = vmul.f32 0.5, %v1742_v3 }
  0x8e   : > { %1111 = vmatprep.mubr.f32.mxu0 %v373_v52  ;;  %1132 = vmatprep.mubr.f32.mxu1 %v387_v57  ;;  %2188 = vst [vmem:[#allocation25_spill] sm:$0xff] %v1722_v42  ;;  %v1728_v52 = vld [vmem:[%s1611_s23 + $0xc8] sm:$0xff]  ;;  %v348_v57 = vmul.f32 0.5, %v316_v41  ;;  %v285_v62 = vmul.f32 0.5, %v1722_v42  ;;  %v366_v41 = vmul.f32 0.5, %v334_v16 }
  0x8f   : > { %1133 = vmatmul.mubr.f32.vlgmr.msra.gmra.mxu1 %v388_v60  ;;  %2189 = vst [vmem:[#allocation26_spill] sm:$0xff] %v1728_v52  ;;  %v333_v60 = vld [vmem:[%s1619_s28 + $0xd0] sm:$0xff]  ;;  %v394_v6 = vadd.f32 %v362_v47, %v298_v46  ;;  %v300_v7 = vmul.f32 0.5, %v1728_v52  ;;  %v367_v46 = vmul.f32 0.5, %v335_v24  ;;  %v1768_v47 = vld [vmem:[%s1611_s23 + $0xe8] sm:$0xff] }
  0x90   : > { %1135 = vmatprep.mubr.f32.mxu1 %v389_v63  ;;  %v349_v63 = vmul.f32 0.5, %v317_v43  ;;  %v365_v12 = vmul.f32 0.5, %v333_v60  ;;  %2197 = vst [vmem:[#allocation34_spill] sm:$0xff] %v1768_v47  ;;  %v289_v60 = vmul.f32 0.5, %v1762_v35  ;;  %v398_v1 = vadd.f32 %v366_v41, %v302_v39 }
  0x91   : > { %1112 = vmatmul.mubr.f32.gmra.mxu0 %v374_v5  ;;  %v319_v5 = vld [vmem:[%s1619_s28 + $0x60] sm:$0xff]  ;;  %v396_v37 = vadd.f32 %v364_v9, %v300_v7 }
  0x92   : > { %1114 = vmatprep.mubr.f32.mxu0 %v375_v10  ;;  %v395_v10 = vadd.f32 %v363_v51, %v299_v49  ;;  %v381_v26 = vadd.f32 %v349_v63, %v285_v62  ;;  %v397_v43 = vadd.f32 %v365_v12, %v301_v11  ;;  %v382_v49 = vadd.f32 %v350_v21, %v286_v19  ;;  %v1778_v62 = vld [vmem:[%s1611_s23 + $0x78] sm:$0xff] }
  0x93   : > { %1136 = vmatmul.mubr.f32.gmra.mxu1 %v390_v17  ;;  %v380_v17 = vadd.f32 %v348_v57, %v284_v56  ;;  %v288_v51 = vmul.f32 0.5, %v1758_v31  ;;  %v337_v56 = vld [vmem:[%s1619_s28 + $0xf0] sm:$0xff]  ;;  %2198 = vst [vmem:[#allocation35_spill] sm:$0xff] %v1778_v62  ;;  %v322_v63 = vld [vmem:[%s1619_s28 + $0x78] sm:$0xff] }
  0x94   : > { %1138 = vmatprep.mubr.f32.mxu1 %v391_v23  ;;  %v1753_v23 = vld [vmem:[%s1611_s23 + $0xe0] sm:$0xff]  ;;  %v1784_v11 = vld [vmem:[%s1611_s23 + $0xf8] sm:$0xff]  ;;  %v354_v19 = vmul.f32 0.5, %v322_v63 }
  0x95   : > { %1115 = vmatmul.mubr.f32.gmra.mxu0 %v376_v29  ;;  %2194 = vst [vmem:[#allocation31_spill] sm:$0xff] %v1753_v23  ;;  %v351_v29 = vmul.f32 0.5, %v319_v5  ;;  %v304_v5 = vmul.f32 0.5, %v1768_v47  ;;  %2199 = vst [vmem:[#allocation36_spill] sm:$0xff] %v1784_v11  ;;  %v338_v12 = vld [vmem:[%s1619_s28 + $0xf8] sm:$0xff]  ;;  %v384_v16 = vadd.f32 %v352_v53, %v288_v51 }
  0x96   : > { %1117 = vmatprep.mubr.f32.mxu0 %v377_v36  ;;  %v321_v36 = vld [vmem:[%s1619_s28 + $0x70] sm:$0xff] }
  0x97   : > { %1139 = vmatmul.mubr.f32.gmra.mxu1 %v392_v44  ;;  %v303_v44 = vmul.f32 0.5, %v1753_v23  ;;  %v383_v57 = vadd.f32 %v351_v29, %v287_v28  ;;  %v370_v28 = vmul.f32 0.5, %v338_v12 }
  0x98   : > { %1141 = vmatprep.mubr.f32.mxu1 %v393_v48  ;;  %v336_v48 = vld [vmem:[%s1619_s28 + $0xe8] sm:$0xff] }
  0x99   : > { %1118 = vmatmul.mubr.f32.gmra.mxu0 %v378_v54  ;;  %v1773_v54 = vld [vmem:[%s1611_s23 + $0xf0] sm:$0xff]  ;;  %v399_v7 = vadd.f32 %v367_v46, %v303_v44 }
  0x9a   : > { %1120 = vmatprep.mubr.f32.mxu0 %v379_v61  ;;  %v353_v61 = vmul.f32 0.5, %v321_v36  ;;  %v305_v9 = vmul.f32 0.5, %v1773_v54 }
  0x9b   : > { %1142 = vmatmul.mubr.f32.gmra.mxu1 %v394_v6  ;;  %v368_v6 = vmul.f32 0.5, %v336_v48 }
  0x9c   : > { %1144 = vmatprep.mubr.f32.mxu1 %v395_v10  ;;  %v369_v10 = vmul.f32 0.5, %v337_v56  ;;  %v385_v21 = vadd.f32 %v353_v61, %v289_v60 }
  0x9d   : > { %1121 = vmatmul.mubr.f32.gmra.mxu0 %v380_v17  ;;  %v290_v17 = vmul.f32 0.5, %v1778_v62  ;;  %v400_v24 = vadd.f32 %v368_v6, %v304_v5 }
  0x9e   : > { %1123 = vmatprep.mubr.f32.mxu0 %v381_v26  ;;  %v306_v26 = vmul.f32 0.5, %v1784_v11  ;;  %v401_v29 = vadd.f32 %v369_v10, %v305_v9 }
  0x9f   : > { %1145 = vmatmul.mubr.f32.gmra.mxu1 %v396_v37  ;;  %v386_v32 = vadd.f32 %v354_v19, %v290_v17 }
  0xa0   : > { %1147 = vmatprep.mubr.f32.mxu1 %v397_v43  ;;  %v402_v36 = vadd.f32 %v370_v28, %v306_v26 }
  0xa1   : > { %1124 = vmatmul.mubr.f32.gmra.mxu0 %v382_v49 }
  0xa2   : > { %1126 = vmatprep.mubr.f32.mxu0 %v383_v57 }
  0xa3   : > { %1148 = vmatmul.mubr.f32.gmra.mxu1 %v398_v1 }
  0xa4   : > { %1150 = vmatprep.mubr.f32.mxu1 %v399_v7 }
  0xa5   : > { %1127 = vmatmul.mubr.f32.gmra.mxu0 %v384_v16 }
  0xa6   : > { %1129 = vmatprep.mubr.f32.mxu0 %v385_v21 }
  0xa7   : > { %1151 = vmatmul.mubr.f32.gmra.mxu1 %v400_v24 }
  0xa8   : > { %1153 = vmatprep.mubr.f32.mxu1 %v401_v29 }
  0xa9   : > { %1130 = vmatmul.mubr.f32.gmra.mxu0 %v386_v32 }
  0xab   : > { %1154 = vmatmul.mubr.f32.gmra.mxu1 %v402_v36 }
 0x14d   : > { %v1789_v37 = vpop.f32.mrf.mxu0 }
 0x14e   : > { %v683_v48 = vmul.f32 %v1789_v37, %v1789_v37 }
 0x14f   : > { %v1791_v39 = vpop.f32.mrf.mxu0  ;;  %v1793_v41 = vpop.f32.mrf.mxu1 }
 0x150   : > { %v682_v43 = vmul.f32 %v1791_v39, %v1791_v39  ;;  %v644_v49 = vadd.f32 %v1789_v37, %v1791_v39 }
 0x151   : > { %v1797_v44 = vpop.f32.mrf.mxu0  ;;  %v1799_v46 = vpop.f32.mrf.mxu1 }
 0x152   : > { %v714_v53 = vadd.f32 %v683_v48, %v682_v43  ;;  %v685_v63 = vmul.f32 %v1797_v44, %v1797_v44 }
 0x153   : > { %v1805_v51 = vpop.f32.mrf.mxu0  ;;  %v1812_v61 = vpop.f32.mrf.mxu1 }
 0x154   : > { %v645_v56 = vadd.f32 %v644_v49, %v1805_v51  ;;  %v684_v57 = vmul.f32 %v1805_v51, %v1805_v51 }
 0x155   : > { %v1810_v60 = vpop.f32.mrf.mxu0  ;;  %v1824_v16 = vpop.f32.mrf.mxu1 }
 0x156   : > { %v715_v1 = vadd.f32 %v714_v53, %v684_v57  ;;  %v646_v5 = vadd.f32 %v1797_v44, %v645_v56  ;;  %v687_v17 = vmul.f32 %v1810_v60, %v1810_v60 }
 0x157   : > { %v1817_v6 = vpop.f32.mrf.mxu0  ;;  %v1836_v36 = vpop.f32.mrf.mxu1 }
 0x158   : > { %v647_v7 = vadd.f32 %v646_v5, %v1817_v6  ;;  %v686_v9 = vmul.f32 %v1817_v6, %v1817_v6  ;;  %v716_v10 = vadd.f32 %v715_v1, %v685_v63 }
 0x159   : > { %v1822_v12 = vpop.f32.mrf.mxu0  ;;  %v1848_v5 = vpop.f32.mrf.mxu1 }
 0x15a   : > { %v717_v19 = vadd.f32 %v716_v10, %v686_v9  ;;  %v648_v21 = vadd.f32 %v1810_v60, %v647_v7  ;;  %v689_v43 = vmul.f32 %v1822_v12, %v1822_v12 }
 0x15b   : > { %v1829_v24 = vpop.f32.mrf.mxu0 }
 0x15c   : > { %v649_v26 = vadd.f32 %v648_v21, %v1829_v24  ;;  %v688_v28 = vmul.f32 %v1829_v24, %v1829_v24  ;;  %v718_v29 = vadd.f32 %v717_v19, %v687_v17 }
 0x15d   : > { %v1834_v32 = vpop.f32.mrf.mxu0 }
 0x15e   : > { %v719_v48 = vadd.f32 %v718_v29, %v688_v28  ;;  %v650_v49 = vadd.f32 %v1822_v12, %v649_v26  ;;  %v691_v7 = vmul.f32 %v1834_v32, %v1834_v32  ;;  %v1860_v29 = vpop.f32.mrf.mxu1 }
 0x15f   : > { %v1841_v53 = vpop.f32.mrf.mxu0 }
 0x160   : > { %v651_v56 = vadd.f32 %v650_v49, %v1841_v53  ;;  %v690_v57 = vmul.f32 %v1841_v53, %v1841_v53  ;;  %v720_v63 = vadd.f32 %v719_v48, %v689_v43 }
 0x161   : > { %v1846_v1 = vpop.f32.mrf.mxu0 }
 0x162   : > { %v721_v9 = vadd.f32 %v720_v63, %v690_v57  ;;  %v652_v10 = vadd.f32 %v1834_v32, %v651_v56  ;;  %v693_v43 = vmul.f32 %v1846_v1, %v1846_v1 }
 0x163   : > { %v1853_v17 = vpop.f32.mrf.mxu0 }
 0x164   : > { %v653_v19 = vadd.f32 %v652_v10, %v1853_v17  ;;  %v692_v21 = vmul.f32 %v1853_v17, %v1853_v17  ;;  %v722_v26 = vadd.f32 %v721_v9, %v691_v7  ;;  %v1872_v7 = vpop.f32.mrf.mxu1 }
 0x165   : > { %v1858_v28 = vpop.f32.mrf.mxu0 }
 0x166   : > { %v723_v48 = vadd.f32 %v722_v26, %v692_v21  ;;  %v654_v49 = vadd.f32 %v1846_v1, %v653_v19  ;;  %v695_v9 = vmul.f32 %v1858_v28, %v1858_v28  ;;  %v1882_v14 = vpop.f32.mrf.mxu1 }
 0x167   : > { %v1865_v57 = vpop.f32.mrf.mxu0 }
 0x168   : > { %v655_v56 = vadd.f32 %v654_v49, %v1865_v57  ;;  %v694_v63 = vmul.f32 %v1865_v57, %v1865_v57  ;;  %v724_v10 = vadd.f32 %v723_v48, %v693_v43 }
 0x169   : > { %v1870_v11 = vpop.f32.mrf.mxu0 }
 0x16a   : > { %v725_v47 = vadd.f32 %v724_v10, %v694_v63  ;;  %v656_v21 = vadd.f32 %v1858_v28, %v655_v56  ;;  %v697_v43 = vmul.f32 %v1870_v11, %v1870_v11  ;;  %v698_v56 = vmul.f32 %v1799_v46, %v1799_v46  ;;  %v1890_v10 = vpop.f32.mrf.mxu1 }
 0x16b   : > { %v1877_v26 = vpop.f32.mrf.mxu0 }
 0x16c   : > { %v657_v19 = vadd.f32 %v656_v21, %v1877_v26  ;;  %v696_v49 = vmul.f32 %v1877_v26, %v1877_v26  ;;  %v726_v23 = vadd.f32 %v725_v47, %v695_v9  ;;  %v699_v21 = vmul.f32 %v1793_v41, %v1793_v41 }
 0x16e   : > { %v658_v48 = vadd.f32 %v1870_v11, %v657_v19  ;;  %v727_v59 = vadd.f32 %v726_v23, %v696_v49  ;;  %v700_v19 = vmul.f32 %v1824_v16, %v1824_v16  ;;  %v701_v49 = vmul.f32 %v1812_v61, %v1812_v61 }
 0x170   : > { %v728_v52 = vadd.f32 %v727_v59, %v697_v43  ;;  %v659_v63 = vadd.f32 %v658_v48, %v1799_v46  ;;  %v1898_v59 = vpop.f32.mrf.mxu1 }
 0x172   : > { %v729_v47 = vadd.f32 %v728_v52, %v698_v56  ;;  %v660_v9 = vadd.f32 %v1793_v41, %v659_v63  ;;  %v702_v52 = vmul.f32 %v1848_v5, %v1848_v5  ;;  %v1906_v56 = vpop.f32.mrf.mxu1 }
 0x174   : > { %v661_v33 = vadd.f32 %v660_v9, %v1824_v16  ;;  %v730_v23 = vadd.f32 %v729_v47, %v699_v21  ;;  %v703_v9 = vmul.f32 %v1836_v36, %v1836_v36 }
 0x176   : > { %v731_v43 = vadd.f32 %v730_v23, %v700_v19  ;;  %v662_v48 = vadd.f32 %v1812_v61, %v661_v33  ;;  %v704_v19 = vmul.f32 %v1872_v7, %v1872_v7  ;;  %v1914_v23 = vpop.f32.mrf.mxu1 }
 0x178   : > { %v663_v27 = vadd.f32 %v662_v48, %v1848_v5  ;;  %v732_v63 = vadd.f32 %v731_v43, %v701_v49  ;;  %v705_v48 = vmul.f32 %v1860_v29, %v1860_v29 }
 0x17a   : > { %v733_v21 = vadd.f32 %v732_v63, %v702_v52  ;;  %v664_v47 = vadd.f32 %v1836_v36, %v663_v27  ;;  %v706_v52 = vmul.f32 %v1890_v10, %v1890_v10  ;;  %v1922_v63 = vpop.f32.mrf.mxu1 }
 0x17c   : > { %v665_v8 = vadd.f32 %v664_v47, %v1872_v7  ;;  %v734_v33 = vadd.f32 %v733_v21, %v703_v9  ;;  %v707_v47 = vmul.f32 %v1882_v14, %v1882_v14 }
 0x17e   : > { %v735_v49 = vadd.f32 %v734_v33, %v704_v19  ;;  %v666_v43 = vadd.f32 %v1860_v29, %v665_v8  ;;  %v708_v19 = vmul.f32 %v1906_v56, %v1906_v56  ;;  %v1930_v33 = vpop.f32.mrf.mxu1 }
 0x180   : > { %v667_v2 = vadd.f32 %v666_v43, %v1890_v10  ;;  %v736_v27 = vadd.f32 %v735_v49, %v705_v48  ;;  %v709_v43 = vmul.f32 %v1898_v59, %v1898_v59 }
 0x182   : > { %v737_v9 = vadd.f32 %v736_v27, %v706_v52  ;;  %v668_v21 = vadd.f32 %v1882_v14, %v667_v2  ;;  %v710_v52 = vmul.f32 %v1922_v63, %v1922_v63  ;;  %v635_v27 = vpop.f32.mrf.mxu1 }
 0x183   : > { %v712_v25 = vmul.f32 %v635_v27, %v635_v27 }
 0x184   : > { %v669_v50 = vadd.f32 %v668_v21, %v1906_v56  ;;  %v738_v8 = vadd.f32 %v737_v9, %v707_v47  ;;  %v711_v21 = vmul.f32 %v1914_v23, %v1914_v23 }
 0x186   : > { %v739_v48 = vadd.f32 %v738_v8, %v708_v19  ;;  %v670_v49 = vadd.f32 %v1898_v59, %v669_v50  ;;  %v713_v19 = vmul.f32 %v1930_v33, %v1930_v33 }
 0x188   : > { %v671_v45 = vadd.f32 %v670_v49, %v1922_v63  ;;  %v740_v2 = vadd.f32 %v739_v48, %v709_v43 }
 0x18a   : > { %v741_v30 = vadd.f32 %v740_v2, %v710_v52  ;;  %v672_v47 = vadd.f32 %v1914_v23, %v671_v45 }
 0x18c   : > { %v673_v9 = vadd.f32 %v672_v47, %v635_v27  ;;  %v742_v22 = vadd.f32 %v741_v30, %v711_v21 }
 0x18e   : > { %v674_v50 = vadd.f32 %v1930_v33, %v673_v9  ;;  %v743_v8 = vadd.f32 %v742_v22, %v712_v25 }
 0x190   : > { %v675_v49 = vrot.slane %v674_v50, 4  ;;  %v744_v62 = vadd.f32 %v743_v8, %v713_v19 }
 0x192   : > { %v676_v35 = vadd.f32 %v675_v49, %v674_v50  ;;  %v745_v43 = vrot.slane %v744_v62, 4 }
 0x194   : > { %v677_v48 = vrot.slane %v676_v35, 2  ;;  %v746_v31 = vadd.f32 %v745_v43, %v744_v62 }
 0x196   : > { %v678_v3 = vadd.f32 %v677_v48, %v676_v35  ;;  %v747_v0 = vrot.slane %v746_v31, 2 }
 0x198   : > { %v679_v52 = vrot.slane %v678_v3, 1  ;;  %v748_v2 = vadd.f32 %v747_v0, %v746_v31 }
 0x19a   : > { %v680_v45 = vadd.f32 %v679_v52, %v678_v3  ;;  %v749_v47 = vrot.slane %v748_v2, 1 }
 0x19c   : > { %v681_v42 = vmul.f32 0.00390625, %v680_v45  ;;  %v750_v30 = vadd.f32 %v749_v47, %v748_v2 }
 0x19e   : > { %v751_v21 = vmul.f32 0.00390625, %v750_v30  ;;  %v752_v40 = vmul.f32 %v681_v42, %v681_v42  ;;  %v756_v22 = vsub.f32 0.0, %v681_v42 }
 0x1a0   : > { %v753_v15 = vsub.f32 %v751_v21, %v752_v40 }
 0x1a2   : > { %v754_v13 = vadd.f32 1e-05, %v753_v15 }
 0x1a4   : > { %1254 = vrsqrt.f32 %v754_v13 }
 0x1b1   : > { %v1255_v25 = vpop.eup %1254 }
 0x1b2   : > { %v1944_v9 = vmul.f32 %v1255_v25, %v756_v22  ;;  %v788_v19 = vmul.f32 %v1255_v25, %v635_v27  ;;  %v758_v62 = vmul.f32 %v1255_v25, %v1791_v39  ;;  %v759_v35 = vmul.f32 %v1255_v25, %v1789_v37 }
 0x1b3   : > { %v760_v0 = vmul.f32 %v1255_v25, %v1805_v51  ;;  %v761_v3 = vmul.f32 %v1255_v25, %v1797_v44  ;;  %v762_v31 = vmul.f32 %v1255_v25, %v1817_v6  ;;  %v763_v50 = vmul.f32 %v1255_v25, %v1810_v60 }
 0x1b4   : > { %v820_v15 = vadd.f32 %v788_v19, %v1944_v9  ;;  %v764_v13 = vmul.f32 %v1255_v25, %v1829_v24  ;;  %v765_v40 = vmul.f32 %v1255_v25, %v1822_v12  ;;  %v766_v42 = vmul.f32 %v1255_v25, %v1841_v53 }
 0x1b5   : > { %v767_v39 = vmul.f32 %v1255_v25, %v1834_v32  ;;  %v768_v37 = vmul.f32 %v1255_v25, %v1853_v17  ;;  %v769_v51 = vmul.f32 %v1255_v25, %v1846_v1  ;;  %v770_v44 = vmul.f32 %v1255_v25, %v1865_v57 }
 0x1b6   : > { %v852_v6 = vadd.f32 %v820_v15, %v1773_v54  ;;  %v771_v60 = vmul.f32 %v1255_v25, %v1858_v28  ;;  %v772_v27 = vmul.f32 %v1255_v25, %v1877_v26  ;;  %v773_v24 = vmul.f32 %v1255_v25, %v1870_v11 }
 0x1b7   : > { %v774_v12 = vmul.f32 %v1255_v25, %v1799_v46  ;;  %v775_v53 = vmul.f32 %v1255_v25, %v1793_v41  ;;  %v776_v32 = vmul.f32 %v1255_v25, %v1824_v16  ;;  %v777_v17 = vmul.f32 %v1255_v25, %v1812_v61 }
 0x1b8   : > { %884 = vst [vmem:[%s1969_s18 + $0xf0] sm:$0xff] %v852_v6  ;;  %v778_v54 = vmul.f32 %v1255_v25, %v1848_v5  ;;  %v779_v1 = vmul.f32 %v1255_v25, %v1836_v36  ;;  %v780_v28 = vmul.f32 %v1255_v25, %v1872_v7  ;;  %v781_v11 = vmul.f32 %v1255_v25, %v1860_v29 }
 0x1b9   : > { %v782_v46 = vmul.f32 %v1255_v25, %v1890_v10  ;;  %v783_v41 = vmul.f32 %v1255_v25, %v1882_v14  ;;  %v784_v16 = vmul.f32 %v1255_v25, %v1906_v56  ;;  %v785_v61 = vmul.f32 %v1255_v25, %v1898_v59 }
 0x1ba   : > { %v786_v57 = vmul.f32 %v1255_v25, %v1922_v63  ;;  %v787_v26 = vmul.f32 %v1255_v25, %v1914_v23  ;;  %v789_v5 = vmul.f32 %v1255_v25, %v1930_v33  ;;  %v790_v36 = vadd.f32 %v758_v62, %v1944_v9 }
 0x1bb   : > { %v791_v7 = vadd.f32 %v759_v35, %v1944_v9  ;;  %v792_v29 = vadd.f32 %v760_v0, %v1944_v9  ;;  %v793_v10 = vadd.f32 %v761_v3, %v1944_v9  ;;  %v794_v14 = vadd.f32 %v762_v31, %v1944_v9 }
 0x1bc   : > { %v795_v56 = vadd.f32 %v763_v50, %v1944_v9  ;;  %v796_v59 = vadd.f32 %v764_v13, %v1944_v9  ;;  %v797_v63 = vadd.f32 %v765_v40, %v1944_v9  ;;  %v798_v23 = vadd.f32 %v766_v42, %v1944_v9 }
 0x1bd   : > { %v799_v33 = vadd.f32 %v767_v39, %v1944_v9  ;;  %v800_v8 = vadd.f32 %v768_v37, %v1944_v9  ;;  %v801_v49 = vadd.f32 %v769_v51, %v1944_v9  ;;  %v802_v43 = vadd.f32 %v770_v44, %v1944_v9 }
 0x1be   : > { %v803_v48 = vadd.f32 %v771_v60, %v1944_v9  ;;  %v804_v52 = vadd.f32 %v772_v27, %v1944_v9  ;;  %v805_v2 = vadd.f32 %v773_v24, %v1944_v9  ;;  %v806_v45 = vadd.f32 %v774_v12, %v1944_v9  ;;  %v2200_v60 = vld [vmem:[#allocation20_spill] sm:$0xff]  ;;  %v2201_v27 = vld [vmem:[#allocation21_spill] sm:$0xff] }
 0x1bf   : > { %v807_v47 = vadd.f32 %v775_v53, %v1944_v9  ;;  %v808_v30 = vadd.f32 %v776_v32, %v1944_v9  ;;  %v809_v21 = vadd.f32 %v777_v17, %v1944_v9  ;;  %v810_v22 = vadd.f32 %v778_v54, %v1944_v9  ;;  %v2202_v24 = vld [vmem:[#allocation24_spill] sm:$0xff]  ;;  %v2207_v17 = vld [vmem:[#allocation33_spill] sm:$0xff] }
 0x1c0   : > { %v811_v25 = vadd.f32 %v779_v1, %v1944_v9  ;;  %v812_v19 = vadd.f32 %v780_v28, %v1944_v9  ;;  %v813_v62 = vadd.f32 %v781_v11, %v1944_v9  ;;  %v814_v35 = vadd.f32 %v782_v46, %v1944_v9  ;;  %v2204_v12 = vld [vmem:[#allocation28_spill] sm:$0xff]  ;;  %v2208_v1 = vld [vmem:[#allocation35_spill] sm:$0xff]  ;;  %v2209_v11 = vld [vmem:[#allocation13_spill] sm:$0xff] }
 0x1c1   : > { %v815_v0 = vadd.f32 %v783_v41, %v1944_v9  ;;  %v816_v3 = vadd.f32 %v784_v16, %v1944_v9  ;;  %v817_v31 = vadd.f32 %v785_v61, %v1944_v9  ;;  %v818_v50 = vadd.f32 %v786_v57, %v1944_v9  ;;  %v2206_v53 = vld [vmem:[#allocation32_spill] sm:$0xff]  ;;  %v2210_v41 = vld [vmem:[#allocation14_spill] sm:$0xff]  ;;  %v2211_v61 = vld [vmem:[#allocation15_spill] sm:$0xff] }
 0x1c2   : > { %v819_v15 = vadd.f32 %v787_v26, %v1944_v9  ;;  %v821_v13 = vadd.f32 %v789_v5, %v1944_v9  ;;  %v822_v40 = vadd.f32 %v790_v36, %v1630_v4  ;;  %v823_v42 = vadd.f32 %v791_v7, %v1635_v18  ;;  %v2212_v26 = vld [vmem:[#allocation16_spill] sm:$0xff]  ;;  %v2213_v36 = vld [vmem:[#allocation17_spill] sm:$0xff] }
 0x1c3   : > { %v824_v39 = vadd.f32 %v792_v29, %v1639_v20  ;;  %v825_v37 = vadd.f32 %v793_v10, %v1657_v34  ;;  %v826_v51 = vadd.f32 %v794_v14, %v1662_v38  ;;  %v827_v44 = vadd.f32 %v795_v56, %v1678_v55  ;;  %v2203_v20 = vld [vmem:[#allocation25_spill] sm:$0xff]  ;;  %v2214_v29 = vld [vmem:[#allocation18_spill] sm:$0xff]  ;;  %v2215_v14 = vld [vmem:[#allocation19_spill] sm:$0xff] }
 0x1c4   : > { %v828_v6 = vadd.f32 %v796_v59, %v1682_v58  ;;  %v829_v9 = vadd.f32 %v797_v63, %v2200_v60  ;;  %v830_v4 = vadd.f32 %v798_v23, %v2201_v27  ;;  %v831_v18 = vadd.f32 %v799_v33, %v2202_v24  ;;  %854 = vst [vmem:[%s1969_s18] sm:$0xff] %v822_v40  ;;  %v2205_v55 = vld [vmem:[#allocation29_spill] sm:$0xff]  ;;  %v2216_v59 = vld [vmem:[#allocation22_spill] sm:$0xff]  ;;  %v2217_v23 = vld [vmem:[#allocation23_spill] sm:$0xff] }
 0x1c5   : > { %855 = vst [vmem:[%s1969_s18 + $0x8] sm:$0xff] %v823_v42  ;;  %v832_v34 = vadd.f32 %v800_v8, %v2203_v20  ;;  %v833_v38 = vadd.f32 %v801_v49, %v2204_v12  ;;  %v834_v58 = vadd.f32 %v802_v43, %v2205_v55  ;;  %v835_v32 = vadd.f32 %v803_v48, %v2206_v53  ;;  %v2218_v8 = vld [vmem:[#allocation26_spill] sm:$0xff]  ;;  %v2219_v43 = vld [vmem:[#allocation27_spill] sm:$0xff] }
 0x1c6   : > { %856 = vst [vmem:[%s1969_s18 + $0x10] sm:$0xff] %v824_v39  ;;  %857 = vst [vmem:[%s1969_s18 + $0x18] sm:$0xff] %v825_v37  ;;  %v836_v54 = vadd.f32 %v804_v52, %v2207_v17  ;;  %v837_v28 = vadd.f32 %v805_v2, %v2208_v1  ;;  %v838_v46 = vadd.f32 %v806_v45, %v2209_v11  ;;  %v2220_v52 = vld [vmem:[#allocation30_spill] sm:$0xff]  ;;  %v2221_v45 = vld [vmem:[#allocation31_spill] sm:$0xff] }
 0x1c7   : > { %858 = vst [vmem:[%s1969_s18 + $0x20] sm:$0xff] %v826_v51  ;;  %859 = vst [vmem:[%s1969_s18 + $0x28] sm:$0xff] %v827_v44  ;;  %v839_v16 = vadd.f32 %v807_v47, %v2210_v41  ;;  %v840_v57 = vadd.f32 %v808_v30, %v2211_v61  ;;  %v841_v5 = vadd.f32 %v809_v21, %v2212_v26  ;;  %v2222_v30 = vld [vmem:[#allocation34_spill] sm:$0xff] }
 0x1c8   : > { %860 = vst [vmem:[%s1969_s18 + $0x30] sm:$0xff] %v828_v6  ;;  %861 = vst [vmem:[%s1969_s18 + $0x38] sm:$0xff] %v829_v9  ;;  %v842_v7 = vadd.f32 %v810_v22, %v2213_v36  ;;  %v843_v10 = vadd.f32 %v811_v25, %v2214_v29  ;;  %v844_v56 = vadd.f32 %v812_v19, %v2215_v14  ;;  %v2223_v22 = vld [vmem:[#allocation36_spill] sm:$0xff] }
 0x1c9   : > { %862 = vst [vmem:[%s1969_s18 + $0x40] sm:$0xff] %v830_v4  ;;  %863 = vst [vmem:[%s1969_s18 + $0x48] sm:$0xff] %v831_v18  ;;  %v845_v63 = vadd.f32 %v813_v62, %v2216_v59  ;;  %v846_v33 = vadd.f32 %v814_v35, %v2217_v23  ;;  %v847_v49 = vadd.f32 %v815_v0, %v2218_v8 }
 0x1ca   : > { %864 = vst [vmem:[%s1969_s18 + $0x50] sm:$0xff] %v832_v34  ;;  %865 = vst [vmem:[%s1969_s18 + $0x58] sm:$0xff] %v833_v38  ;;  %v848_v48 = vadd.f32 %v816_v3, %v2219_v43  ;;  %v849_v2 = vadd.f32 %v817_v31, %v2220_v52  ;;  %v850_v47 = vadd.f32 %v818_v50, %v2221_v45 }
 0x1cb   : > { %866 = vst [vmem:[%s1969_s18 + $0x60] sm:$0xff] %v834_v58  ;;  %867 = vst [vmem:[%s1969_s18 + $0x68] sm:$0xff] %v835_v32  ;;  %v851_v21 = vadd.f32 %v819_v15, %v2222_v30  ;;  %v853_v25 = vadd.f32 %v821_v13, %v2223_v22 }
 0x1cc   : > { %868 = vst [vmem:[%s1969_s18 + $0x70] sm:$0xff] %v836_v54  ;;  %869 = vst [vmem:[%s1969_s18 + $0x78] sm:$0xff] %v837_v28 }
 0x1cd   : > { %870 = vst [vmem:[%s1969_s18 + $0x80] sm:$0xff] %v838_v46  ;;  %871 = vst [vmem:[%s1969_s18 + $0x88] sm:$0xff] %v839_v16 }
 0x1ce   : > { %872 = vst [vmem:[%s1969_s18 + $0x90] sm:$0xff] %v840_v57  ;;  %873 = vst [vmem:[%s1969_s18 + $0x98] sm:$0xff] %v841_v5 }
 0x1cf   : > { %874 = vst [vmem:[%s1969_s18 + $0xa0] sm:$0xff] %v842_v7  ;;  %875 = vst [vmem:[%s1969_s18 + $0xa8] sm:$0xff] %v843_v10 }
 0x1d0   : > { %876 = vst [vmem:[%s1969_s18 + $0xb0] sm:$0xff] %v844_v56  ;;  %877 = vst [vmem:[%s1969_s18 + $0xb8] sm:$0xff] %v845_v63 }
 0x1d1   : > { %878 = vst [vmem:[%s1969_s18 + $0xc0] sm:$0xff] %v846_v33  ;;  %879 = vst [vmem:[%s1969_s18 + $0xc8] sm:$0xff] %v847_v49 }
 0x1d2   : > { %880 = vst [vmem:[%s1969_s18 + $0xd0] sm:$0xff] %v848_v48  ;;  %881 = vst [vmem:[%s1969_s18 + $0xd8] sm:$0xff] %v849_v2 }
 0x1d3   : > { %882 = vst [vmem:[%s1969_s18 + $0xe0] sm:$0xff] %v850_v47  ;;  %883 = vst [vmem:[%s1969_s18 + $0xe8] sm:$0xff] %v851_v21 }
 0x1d4   : > { %885 = vst [vmem:[%s1969_s18 + $0xf8] sm:$0xff] %v853_v25 }
 0x1d5   : > { %1351 = shalt.err (!%p1348_p11)
}
 0x1d6   : > { %s1352_s17 = scalar_lea.hbm %s2071_s21, 4096  ;;  %s1356_s2 = scalar_lea.hbm %s2128_s3, 16384 }
 0x1d7   : > { %p1353_p1 = scmp.ne.s32.totalorder %s2071_s21, %s1352_s17  ;;  %p1357_p7 = scmp.lt.s32.totalorder %s2071_s21, %s2128_s3 }
 0x1d8   : > { %p1358_p8 = scmp.lt.s32.totalorder %s1356_s2, %s1352_s17 }
 0x1d9   : > { %p1354_p4 = pnand %p1353_p1, %p2224_p9 }
 0x1da   : > { %p1359_p10 = por %p1358_p8, %p1357_p7 }
 0x1db   : > { %p1355_p3 = pneg %p1354_p4 }
 0x1dd   : > { %p1360_p6 = pnand %p1359_p10, %p1355_p3 }
 0x1df   : > { %1363 = shalt.err (!%p1360_p6)
}
 0x1e0   : > { %s1418_s20 = smov 128   ;;  %s1419_s27 = smov 8  }
 0x1e1   : > { %1196 = dma.vmem_to_hbm [thread:$0]  (%p2224_p9), %s2073_s10, 4096, %s2071_s21, %s887_s7, %s1418_s20, %s1418_s20, %s1419_s27  }
 0x1e2 PF: > { %p1216_p12 = scmp.ge.s32.totalorder %s1410_s15, 2  ;;  %s915_s28 = sand.u32 1, %s1398_s12  }
 0x1e3   : > { %p2225_p13 = scmp.ne.s32.totalorder %s2163_s19, 0  ;;  %s916_s18 = scalar_lea.sflag [#allocation4], %s915_s28 }
 0x1e5   : > { %p1210_p0 = pnand %p1216_p12, %p2225_p13 }
 0x1e7   : > { %p1211_p5 = pneg %p1210_p0 }
 0x1e9   : > { %1393 = dma.done.wait (%p1211_p5), %s916_s18, 4096  }
 0x1ea   : > { %1395 = vsyncadd (%p1211_p5), %s916_s18, 4294963200  ;;  %p19_p2 = scmp.ge.s32.totalorder %s1493_s24, 6   ;;  %s2226_s12 = smov %s1402_s13 }
 0x1eb   : > { %s2227_s13 = smov %s1406_s14  ;;  %s2228_s14 = smov %s1513_s5 }
 0x1ec   : > { %s2229_s15 = smov %s1493_s24  ;;  %21 = sbr.rel (!%p19_p2) target bundleno = 10 (0xa), region = 94 }
 0x1f1   :  { %921 = vsyncpa [#allocation3], 1 }
 0x1f2   :  { %923 = vsyncpa [#allocation3 + $0x1], 1 }
 0x1f3   :  { %924 = vsyncpa [#allocation6], 1 }
 0x1f4   :  { %926 = vsyncpa [#allocation6 + $0x1], 1 }
 0x1f5   :  { %927 = vsyncpa [#allocation4], 1 }
 0x1f6   :  { %929 = vsyncpa [#allocation4 + $0x1], 1 }

</bundles_post_ra>
